<compile_context>
chip_gen: v7x
topology: tpu7x:2x2x1
jax: 0.10.0
libtpu: 0.0.40
codegen_flags: <defaults>
</compile_context>

<pallas_src>
import functools
import math

import jax
import jax.numpy as jnp
import numpy as np
from jax.experimental import pallas as pl
from jax.experimental.pallas import tpu as pltpu

_INV_LN10 = 1.0 / math.log(10.0)
_MIB = 1024 * 1024


# --------------------------------------------------------------------------
# Kernels: stream (1, tile_rows, L) blocks, accumulate lane-partial sums into
# the resident (1, 1, L) output block (init at k==0, no separate epilogue).
# --------------------------------------------------------------------------
def _rmsle_unweighted_kernel(gt_ref, pred_ref, num_ref, *, use_log10: bool,
                             n_rows: int, tile_rows: int,
                             steps_per_chunk: int, needs_mask: bool):
    c = pl.program_id(1)
    k = pl.program_id(2)

    @pl.when(k == 0)
    def _():
        num_ref[...] = jnp.zeros_like(num_ref)

    # Stream in native dtype, cast post-DMA (keeps HBM traffic narrow).
    gt = gt_ref[...].astype(jnp.float32)          # (1, tile_rows, L)
    pred = pred_ref[...].astype(jnp.float32)

    pred_fix = jnp.where(pred == 0.0, jnp.float32(1e-24), pred)
    diff = jnp.log(gt) - jnp.log(pred_fix)
    if use_log10:
        # log10(x) - log10(y) == (log(x) - log(y)) / log(10)
        diff = diff * jnp.float32(_INV_LN10)
    sq = diff * diff

    if needs_mask:
        # Ragged / duplicated tail tiles: select (not multiply) away rows past
        # the end of the sample so NaN/Inf from garbage data is discarded.
        row_ids = jax.lax.broadcasted_iota(jnp.int32, sq.shape, 1)
        start = (c * steps_per_chunk + k) * tile_rows
        sq = jnp.where(start + row_ids < n_rows, sq, 0.0)

    num_ref[...] += jnp.sum(sq, axis=1, keepdims=True)      # (1, 1, L)


def _rmsle_weighted_kernel(gt_ref, pred_ref, w_ref, num_ref, den_ref, *,
                           use_log10: bool, n_rows: int, tile_rows: int,
                           steps_per_chunk: int, needs_mask: bool):
    c = pl.program_id(1)
    k = pl.program_id(2)

    @pl.when(k == 0)
    def _():
        num_ref[...] = jnp.zeros_like(num_ref)
        den_ref[...] = jnp.zeros_like(den_ref)

    gt = gt_ref[...].astype(jnp.float32)          # (1, tile_rows, L)
    pred = pred_ref[...].astype(jnp.float32)
    w = w_ref[...].astype(jnp.float32)            # weights may be bf16/int8/bool

    pred_fix = jnp.where(pred == 0.0, jnp.float32(1e-24), pred)
    diff = jnp.log(gt) - jnp.log(pred_fix)
    if use_log10:
        diff = diff * jnp.float32(_INV_LN10)
    sq = diff * diff * w

    if needs_mask:
        row_ids = jax.lax.broadcasted_iota(jnp.int32, sq.shape, 1)
        start = (c * steps_per_chunk + k) * tile_rows
        valid = start + row_ids < n_rows
        sq = jnp.where(valid, sq, 0.0)
        w = jnp.where(valid, w, 0.0)

    num_ref[...] += jnp.sum(sq, axis=1, keepdims=True)       # (1, 1, L)
    den_ref[...] += jnp.sum(w, axis=1, keepdims=True)        # (1, 1, L)


# --------------------------------------------------------------------------
# Wrapper helpers
# --------------------------------------------------------------------------
def _vmem_budget_and_limit():
    """Per-generation pipeline-buffer budget + explicit scoped-VMEM limit."""
    try:
        cap = int(pltpu.get_tpu_info().vmem_capacity_bytes)
    except Exception:
        cap = 0
    if cap < 32 * _MIB:            # unknown / implausible -> assume 128 MiB
        cap = 128 * _MIB
    budget = min(cap // 3, 24 * _MIB)            # v7x(64MiB)->~21MiB, else 24MiB
    limit = int(min(cap - 8 * _MIB, budget + 16 * _MIB))
    return budget, max(limit, 16 * _MIB)


def _pick_tile_rows(n_rows, lane_width, in_dtypes, budget_bytes):
    """tr = budget / (2 buffers * sum_streams(lane_pad * itemsize)), 8-aligned."""
    lane_pad = ((lane_width + 127) // 128) * 128      # VMEM lane padding
    per_row = 2 * sum(lane_pad * jnp.dtype(dt).itemsize for dt in in_dtypes)
    tr = int(budget_bytes // max(per_row, 1))
    if tr >= n_rows:
        return n_rows                                  # full-extent block
    tr = (tr // 8) * 8
    return max(8, tr) if n_rows >= 8 else n_rows


# --------------------------------------------------------------------------
# Public entry point
# --------------------------------------------------------------------------
def rmsle(gt, pred, weights=None, base: str = 'natural', max_tile_rows=None):
    """Pallas RMSLE. gt/pred/(weights) are N[CHW...] arrays of equal shape."""
    assert gt.shape == pred.shape
    B = gt.shape[0]
    feat = gt.shape[1:]
    n = int(np.prod(feat)) if len(feat) else 1

    # Pad-free lane-dense per-sample view (S rows, L lanes).
    if n % 128 == 0 and n > 0:
        L, S = 128, n // 128                    # perfect lane density
    elif len(feat) >= 2:
        L = int(feat[-1])                       # "full last dim" block exception
        S = n // L
    else:
        L, S = max(n, 1), 1

    gt3 = gt.reshape(B, S, L)                   # contiguous -> free reshape
    pred3 = pred.reshape(B, S, L)
    w3 = None
    if weights is not None:
        assert weights.shape == gt.shape
        w3 = weights.reshape(B, S, L)           # streamed in its native dtype

    in_dtypes = [gt3.dtype, pred3.dtype] + ([w3.dtype] if w3 is not None else [])
    budget, vmem_limit = _vmem_budget_and_limit()
    tr = _pick_tile_rows(S, L, in_dtypes, budget)
    if max_tile_rows is not None:
        cap_r = max(1, int(max_tile_rows))
        if cap_r < tr:
            tr = max(8, (cap_r // 8) * 8) if S >= 8 else S
    total_steps = -(-S // tr)

    # Core-split of the row sweep: gives v7x's second TensorCore work when the
    # batch alone can't ("parallel" axis); near-free on single-TC chips.
    NC = 2 if (total_steps >= 2 and (B <= 2 or B % 2 == 1)) else 1
    K = -(-total_steps // NC)
    last_blk = total_steps - 1
    needs_mask = (NC * K * tr != S)

    if NC * K == total_steps:
        in_idx = lambda b, c, k: (b, c * K + k, 0)
    else:
        # Duplicate tail steps re-read the last real block; the in-kernel row
        # mask zeroes their contribution.
        in_idx = lambda b, c, k: (b, jnp.minimum(c * K + k, last_blk), 0)
    out_idx = lambda b, c, k: (b, c, 0)

    in_spec = pl.BlockSpec((1, tr, L), in_idx)
    out_spec = pl.BlockSpec((1, 1, L), out_idx)
    out_sds = jax.ShapeDtypeStruct((B, NC, L), jnp.float32)

    use_log10 = (base != 'natural')
    cparams = pltpu.CompilerParams(
        dimension_semantics=("parallel", "parallel", "arbitrary"),
        vmem_limit_bytes=int(vmem_limit))
    common = dict(use_log10=use_log10, n_rows=S, tile_rows=tr,
                  steps_per_chunk=K, needs_mask=needs_mask)

    if w3 is None:
        kernel = functools.partial(_rmsle_unweighted_kernel, **common)
        num = pl.pallas_call(
            kernel,
            out_shape=out_sds,
            grid_spec=pltpu.PrefetchScalarGridSpec(
                num_scalar_prefetch=0,
                grid=(B, NC, K),
                in_specs=[in_spec, in_spec],
                out_specs=out_spec),
            compiler_params=cparams,
        )(gt3, pred3)
        # tiny epilogue in the wrapper: per-sample mean -> sqrt -> batch mean
        rms = jnp.sqrt(jnp.sum(num, axis=(1, 2)) / jnp.float32(n))
    else:
        kernel = functools.partial(_rmsle_weighted_kernel, **common)
        num, den = pl.pallas_call(
            kernel,
            out_shape=(out_sds, out_sds),
            grid_spec=pltpu.PrefetchScalarGridSpec(
                num_scalar_prefetch=0,
                grid=(B, NC, K),
                in_specs=[in_spec, in_spec, in_spec],
                out_specs=[out_spec, out_spec]),
            compiler_params=cparams,
        )(gt3, pred3, w3)
        rms = jnp.sqrt(jnp.sum(num, axis=(1, 2)) / jnp.sum(den, axis=(1, 2)))
    return jnp.mean(rms)


# --------------------------------------------------------------------------
# Pure-JAX reference mirroring the PyTorch module
# --------------------------------------------------------------------------
def _rmsle_ref(gt, pred, weights=None, base='natural'):
    log = jnp.log if base == 'natural' else jnp.log10
    gt = gt.astype(jnp.float32)
    pred = pred.astype(jnp.float32)
    pred_fix = jnp.where(pred == 0.0, pred + 1e-24, pred)
    log_diff_sq = (log(gt) - log(pred_fix)) ** 2
    red_axes = tuple(range(1, gt.ndim))
    if weights is None:
        return jnp.mean(jnp.sqrt(jnp.mean(log_diff_sq, axis=red_axes)))
    weights = weights.astype(jnp.float32)
    log_diff_sq = log_diff_sq * weights
    num = jnp.sum(log_diff_sq, axis=red_axes)
    den = jnp.sum(weights, axis=red_axes)
    return jnp.mean(jnp.sqrt(num / den))


if __name__ == "__main__":
    key = jax.random.PRNGKey(0)
    k1, k2, k3 = jax.random.split(key, 3)

    B, C, H, W = 2, 4, 16, 16
    gt = jax.random.uniform(k1, (B, C, H, W), jnp.float32, 0.1, 2.0)
    pred = jax.random.uniform(k2, (B, C, H, W), jnp.float32, 0.1, 2.0)
    weights = jax.random.uniform(k3, (B, C, H, W), jnp.float32, 0.5, 1.5)

    # unweighted, natural log (128-divisible fast path)
    out_u = jax.block_until_ready(rmsle(gt, pred))
    np.testing.assert_allclose(np.asarray(out_u), np.asarray(_rmsle_ref(gt, pred)),
                               rtol=1e-5, atol=1e-6)

    # weighted, log10
    out_w = jax.block_until_ready(rmsle(gt, pred, weights, base='10'))
    np.testing.assert_allclose(np.asarray(out_w),
                               np.asarray(_rmsle_ref(gt, pred, weights, base='10')),
                               rtol=1e-5, atol=1e-6)

    # bf16 inputs streamed narrow, cast in-kernel
    out_bf = jax.block_until_ready(
        rmsle(gt.astype(jnp.bfloat16), pred.astype(jnp.bfloat16)))
    ref_bf = _rmsle_ref(gt.astype(jnp.bfloat16), pred.astype(jnp.bfloat16))
    np.testing.assert_allclose(np.asarray(out_bf), np.asarray(ref_bf),
                               rtol=2e-2, atol=1e-3)

    # ragged feature count (n % 128 != 0) -> pad-free full-last-dim path,
    # small row tile forces core-split + ragged-row masking.
    gt_r = jax.random.uniform(k1, (2, 3, 20, 24), jnp.float32, 0.1, 2.0)
    pred_r = jax.random.uniform(k2, (2, 3, 20, 24), jnp.float32, 0.1, 2.0)
    w_r = jax.random.uniform(k3, (2, 3, 20, 24), jnp.float32, 0.5, 1.5)
    out_r = jax.block_until_ready(rmsle(gt_r, pred_r, max_tile_rows=8))
    np.testing.assert_allclose(np.asarray(out_r), np.asarray(_rmsle_ref(gt_r, pred_r)),
                               rtol=1e-5, atol=1e-6)
    out_rw = jax.block_until_ready(rmsle(gt_r, pred_r, w_r, max_tile_rows=8))
    np.testing.assert_allclose(np.asarray(out_rw),
                               np.asarray(_rmsle_ref(gt_r, pred_r, w_r)),
                               rtol=1e-5, atol=1e-6)

    # batch=1, odd step count -> exercises the clamped-index core-split path
    gt_1 = jax.random.uniform(k1, (1, 3, 20, 24), jnp.float32, 0.1, 2.0)
    pred_1 = jax.random.uniform(k2, (1, 3, 20, 24), jnp.float32, 0.1, 2.0)
    out_1 = jax.block_until_ready(rmsle(gt_1, pred_1, max_tile_rows=24))
    np.testing.assert_allclose(np.asarray(out_1), np.asarray(_rmsle_ref(gt_1, pred_1)),
                               rtol=1e-5, atol=1e-6)

    print("KERNEL_OK")
</pallas_src>

<mosaic_0001>
module attributes {stable_mosaic.version = 11 : i64} {
  func.func @_rmsle_unweighted_kernel(%arg0: i32, %arg1: i32, %arg2: i32, %arg3: memref<1x8x128xf32, #tpu.memory_space<vmem>>, %arg4: memref<1x8x128xf32, #tpu.memory_space<vmem>>, %arg5: memref<1x1x128xf32, #tpu.memory_space<vmem>>) attributes {dimension_semantics = [#tpu.dimension_semantics<parallel>, #tpu.dimension_semantics<parallel>, #tpu.dimension_semantics<arbitrary>], iteration_bounds = array<i64: 2, 1, 1>, scalar_prefetch = 0 : i64, scratch_operands = 0 : i64, tpu.core_type = #tpu.core_type<tc>, window_params = [{transform_indices = @transform_0, window_bounds = array<i64: 1, 8, 128>}, {transform_indices = @transform_1, window_bounds = array<i64: 1, 8, 128>}, {transform_indices = @transform_2, window_bounds = array<i64: 1, 1, 128>}]} {
    %c0_i32 = arith.constant 0 : i32
    %0 = arith.cmpi eq, %arg2, %c0_i32 : i32
    %1 = arith.extui %0 : i1 to i32
    %c0_i32_0 = arith.constant 0 : i32
    %2 = arith.cmpi ne, %1, %c0_i32_0 : i32
    scf.if %2 {
      %cst_14 = arith.constant 0.000000e+00 : f32
      %18 = vector.broadcast %cst_14 : f32 to vector<1x1x128xf32>
      %c0_15 = arith.constant 0 : index
      %c0_16 = arith.constant 0 : index
      %c0_17 = arith.constant 0 : index
      %19 = vector.load %arg5[%c0_15, %c0_16, %c0_17] : memref<1x1x128xf32, #tpu.memory_space<vmem>>, vector<1x1x128xf32>
      tpu.vector_store %arg5[%c0_15, %c0_16, %c0_17], %18 {strides = array<i32>} : memref<1x1x128xf32, #tpu.memory_space<vmem>>, vector<1x1x128xf32>,
    } else {
    }
    %c0 = arith.constant 0 : index
    %c0_1 = arith.constant 0 : index
    %c0_2 = arith.constant 0 : index
    %3 = vector.load %arg3[%c0, %c0_1, %c0_2] : memref<1x8x128xf32, #tpu.memory_space<vmem>>, vector<1x8x128xf32>
    %c0_3 = arith.constant 0 : index
    %c0_4 = arith.constant 0 : index
    %c0_5 = arith.constant 0 : index
    %4 = vector.load %arg4[%c0_3, %c0_4, %c0_5] : memref<1x8x128xf32, #tpu.memory_space<vmem>>, vector<1x8x128xf32>
    %cst = arith.constant 0.000000e+00 : f32
    %5 = vector.broadcast %cst : f32 to vector<1x8x128xf32>
    %6 = arith.cmpf oeq, %4, %5 : vector<1x8x128xf32>
    %cst_6 = arith.constant 1.000000e-24 : f32
    %7 = vector.broadcast %cst_6 : f32 to vector<1x8x128xf32>
    %8 = arith.select %6, %7, %4 : vector<1x8x128xi1>, vector<1x8x128xf32>
    %9 = math.log %3 : vector<1x8x128xf32>
    %10 = math.log %8 : vector<1x8x128xf32>
    %11 = arith.subf %9, %10 : vector<1x8x128xf32>
    %12 = arith.mulf %11, %11 : vector<1x8x128xf32>
    %c0_7 = arith.constant 0 : index
    %c0_8 = arith.constant 0 : index
    %c0_9 = arith.constant 0 : index
    %13 = vector.load %arg5[%c0_7, %c0_8, %c0_9] : memref<1x1x128xf32, #tpu.memory_space<vmem>>, vector<1x1x128xf32>
    %cst_10 = arith.constant dense<0.000000e+00> : vector<1x128xf32>
    %14 = vector.multi_reduction <add>, %12, %cst_10 [1] : vector<1x8x128xf32> to vector<1x128xf32>
    %15 = vector.shape_cast %14 : vector<1x128xf32> to vector<1x1x128xf32>
    %16 = arith.addf %13, %15 : vector<1x1x128xf32>
    %c0_11 = arith.constant 0 : index
    %c0_12 = arith.constant 0 : index
    %c0_13 = arith.constant 0 : index
    %17 = vector.load %arg5[%c0_11, %c0_12, %c0_13] : memref<1x1x128xf32, #tpu.memory_space<vmem>>, vector<1x1x128xf32>
    tpu.vector_store %arg5[%c0_11, %c0_12, %c0_13], %16 {strides = array<i32>} : memref<1x1x128xf32, #tpu.memory_space<vmem>>, vector<1x1x128xf32>,
    return
  }
  func.func @transform_0(%arg0: i32, %arg1: i32, %arg2: i32) -> (i32, i32, i32) {
    %c1_i32 = arith.constant 1 : i32
    %0 = arith.muli %arg1, %c1_i32 : i32
    %1 = arith.addi %0, %arg2 : i32
    %c0_i32 = arith.constant 0 : i32
    %c0_i32_0 = arith.constant 0 : i32
    return %arg0, %1, %c0_i32 : i32, i32, i32
  }
  func.func @transform_1(%arg0: i32, %arg1: i32, %arg2: i32) -> (i32, i32, i32) {
    %c1_i32 = arith.constant 1 : i32
    %0 = arith.muli %arg1, %c1_i32 : i32
    %1 = arith.addi %0, %arg2 : i32
    %c0_i32 = arith.constant 0 : i32
    %c0_i32_0 = arith.constant 0 : i32
    return %arg0, %1, %c0_i32 : i32, i32, i32
  }
  func.func @transform_2(%arg0: i32, %arg1: i32, %arg2: i32) -> (i32, i32, i32) {
    %c0_i32 = arith.constant 0 : i32
    %c0_i32_0 = arith.constant 0 : i32
    return %arg0, %arg1, %c0_i32 : i32, i32, i32
  }
}

</mosaic_0001>

<bundles_post_ra>
// kernel: tpu_custom_call.1
= control target key start
LH: loop header
LB: loop body
LE: loop exit
PB: predicated region body
PF: predicated region fallthrough
CT: control target
= control target key end

     0   :  { %7 = vsyncpa [#allocation3], 0  ;;  %s847_s0 = inlined_call_operand.hbm [shape: f32[2,8,128], index: 0, kind: input, shape index: {}]   ;;  %s848_s1 = inlined_call_operand.hbm [shape: f32[2,8,128], index: 1, kind: input, shape index: {}]   ;;  %s849_s2 = inlined_call_operand.hbm [shape: f32[2,1,128], index: 2, kind: output, shape index: {}]  }
   0x1   :  { %9 = vsyncpa [#allocation3 + $0x1], 0 }
   0x2   :  { %10 = vsyncpa [#allocation6], 0 }
   0x3   :  { %12 = vsyncpa [#allocation6 + $0x1], 0 }
   0x4   :  { %13 = vsyncpa [#allocation4], 0 }
   0x5   :  { %15 = vsyncpa [#allocation4 + $0x1], 0  ;;  %s626_s9 = smov 0   ;;  %s628_s10 = smov 0  }
   0x6   :  { %s630_s11 = smov 0   ;;  %s632_s12 = smov 0  }
   0x7   :  { %s634_s13 = smov 0   ;;  %s636_s14 = smov 0  }
   0x8 LB: > { %s373_s15 = sadd.s32 4294967295, %s605_s14   ;;  %s374_s16 = sadd.s32 4294967294, %s605_s14   ;;  %s605_s14 = sphi %s636_s14, %s21_s14   ;;  %s601_s13 = sphi %s634_s13, %s869_s13   ;;  %s597_s12 = sphi %s632_s12, %s868_s12   ;;  %s593_s11 = sphi %s630_s11, %s867_s11   ;;  %s589_s10 = sphi %s628_s10, %s866_s10   ;;  %s585_s9 = sphi %s626_s9, %s865_s9  }
   0x9   : > { %s40_s17 = sadd.s32 1, %s601_s13  ;;  %s51_s18 = sadd.s32 1, %s593_s11 }
   0xa   : > { %p42_p0 = scmp.ge.s32.totalorder %s40_s17, 2  ;;  %p58_p1 = scmp.ne.s32.totalorder %s593_s11, %s589_s10 }
   0xb   : > { %p59_p2 = scmp.eq.s32.totalorder %s605_s14, 0  ;;  %p64_p3 = scmp.ne.s32.totalorder %s589_s10, %s585_s9 }
   0xc   : > { %s871_s17 = smov (%p42_p0, %s40_s17), 0  ;;  %p65_p5 = scmp.eq.s32.totalorder %s373_s15, 0 }
   0xd   : > { %p667_p4 = por %p59_p2, %p58_p1  ;;  %s46_s20 = ssub.s32 %s601_s13, %s871_s17 }
   0xe   : > { %p120_p6 = scmp.eq.s32.totalorder %s373_s15, 1  ;;  %p49_p7 = scmp.eq.s32.totalorder %s46_s20, 0 }
   0xf   : > { %p673_p8 = por %p65_p5, %p64_p3  ;;  %p126_p10 = scmp.eq.s32.totalorder %s374_s16, 1 }
  0x10   : > { %p677_p9 = por %p120_p6, %p58_p1  ;;  %p404_p13 = scmp.lt.s32.totalorder %s605_s14, 2 }
  0x11   : > { %s853_s21 = scalar_select %p673_p8, 1, 0 }
  0x12   : > { %s854_s22 = scalar_select %p677_p9, 1, 0 }
  0x13   : > { %s682_s23 = scalar_select %p49_p7, %s593_s11, %s51_s18  }
  0x14   : > { %p684_p11 = por %p126_p10, %p64_p3  ;;  %s691_s25 = sand.u32 1, %s593_s11  }
  0x15   : > { %s377_s26 = sshll.u32 %s691_s25, 3  ;;  %s378_s27 = sshll.u32 %s601_s13, 7 }
  0x16   : > { %s855_s24 = scalar_select %p684_p11, 1, 0 }
  0x17   : > { %s700_s30 = scalar_lea.hbm %s847_s0, %s378_s27  ;;  %s150_s3 = scalar_lea.vmem [#allocation2], %s377_s26 }
  0x18   : > { %s159_s4 = sshll.u32 %s150_s3, 4  ;;  %p708_p0 = pnand %p404_p13, %p667_p4  ;;  %s704_s4 = int_to_ptr.vmem [resolvable:$true] %s159_s4 }
  0x19   : > { %s147_s6 = scalar_lea.sflag [#allocation3], %s691_s25  ;;  %s459_s7 = scalar_lea.hbm %s700_s30, 128 }
  0x1a   : > { %p460_p3 = scmp.ne.s32.totalorder %s700_s30, %s459_s7  ;;  %p461_p5 = pneg %p708_p0 }
  0x1b   : > { %s464_s16 = scalar_lea.hbm %s847_s0, 256  ;;  %p465_p4 = scmp.lt.u32.totalorder %s700_s30, %s847_s0 }
  0x1c   : > { %p462_p6 = pnand %p461_p5, %p460_p3  ;;  %p466_p10 = scmp.lt.u32.totalorder %s464_s16, %s459_s7 }
  0x1d   : > { %p468_p12 = scmp.lt.u32.totalorder %s459_s7, %s700_s30 }
  0x1e   : > { %p463_p7 = pneg %p462_p6  ;;  %p467_p13 = por %p466_p10, %p465_p4 }
  0x20   : > { %p469_p1 = por %p468_p12, %p467_p13 }
  0x22   : > { %p470_p2 = pnand %p469_p1, %p463_p7 }
  0x24   : > { %473 = shalt.err (!%p470_p2)
}
  0x25   : > { %s474_s20 = scalar_lea.vmem %s704_s4, 128  ;;  %s607_s28 = smov [#allocation2]  }
  0x26   : > { %p475_p3 = scmp.ne.s32.totalorder %s704_s4, %s474_s20  ;;  %s479_s29 = sshll.u32 %s607_s28, 4  ;;  %s480_s29 = int_to_ptr.vmem [resolvable:$false] %s479_s29 }
  0x27   : > { %s481_s3 = scalar_lea.vmem %s480_s29, 256  ;;  %p482_p9 = scmp.lt.s32.totalorder %s704_s4, %s480_s29 }
  0x28   : > { %p477_p6 = pnand %p475_p3, %p461_p5  ;;  %p483_p4 = scmp.lt.s32.totalorder %s481_s3, %s474_s20 }
  0x2a   : > { %p478_p11 = pneg %p477_p6  ;;  %p484_p10 = por %p483_p4, %p482_p9 }
  0x2c   : > { %p485_p12 = pnand %p484_p10, %p478_p11 }
  0x2e   : > { %488 = shalt.err (!%p485_p12)
}
  0x2f   : > { %396 = dma.hbm_to_vmem [thread:$0]  (!%p708_p0), %s700_s30, 128, %s704_s4, %s147_s6  }
  0x30   : > { %p857_p1 = scmp.lt.s32.totalorder %s605_s14, 3  ;;  %p858_p2 = scmp.ge.s32.totalorder %s605_s14, 1 }
  0x31   : > { %s753_s16 = scalar_lea.hbm %s848_s1, %s378_s27  ;;  %s170_s18 = scalar_lea.vmem [#allocation5], %s377_s26 }
  0x32   : > { %p744_p7 = pnand %p858_p2, %p857_p1  ;;  %s179_s19 = sshll.u32 %s170_s18, 4  ;;  %s180_s19 = int_to_ptr.vmem [resolvable:$true] %s179_s19 }
  0x33   : > { %s167_s30 = scalar_lea.sflag [#allocation6], %s691_s25  ;;  %s489_s4 = scalar_lea.hbm %s753_s16, 128 }
  0x34   : > { %s859_s7 = scalar_select %p744_p7, 1, 0 }
  0x35   : > { %p490_p9 = scmp.ne.s32.totalorder %s753_s16, %s489_s4  ;;  %s494_s27 = scalar_lea.hbm %s848_s1, 256 }
  0x36   : > { %p495_p3 = scmp.lt.u32.totalorder %s753_s16, %s848_s1  ;;  %p496_p6 = scmp.lt.u32.totalorder %s494_s27, %s489_s4 }
  0x37   : > { %p492_p11 = pnand %p490_p9, %p461_p5  ;;  %p498_p10 = scmp.lt.u32.totalorder %s489_s4, %s753_s16 }
  0x38   : > { %p497_p4 = por %p496_p6, %p495_p3 }
  0x39   : > { %p493_p13 = pneg %p492_p11 }
  0x3a   : > { %p499_p12 = por %p498_p10, %p497_p4 }
  0x3c   : > { %p500_p1 = pnand %p499_p12, %p493_p13 }
  0x3e   : > { %503 = shalt.err (!%p500_p1)
}
  0x3f   : > { %s504_s25 = scalar_lea.vmem %s180_s19, 128  ;;  %s608_s26 = smov [#allocation5]  }
  0x40   : > { %p505_p2 = scmp.ne.s32.totalorder %s180_s19, %s504_s25  ;;  %s509_s3 = sshll.u32 %s608_s26, 4  ;;  %s510_s3 = int_to_ptr.vmem [resolvable:$false] %s509_s3 }
  0x41   : > { %s511_s8 = scalar_lea.vmem %s510_s3, 256  ;;  %p512_p8 = scmp.lt.s32.totalorder %s180_s19, %s510_s3 }
  0x42   : > { %p507_p9 = pnand %p505_p2, %p461_p5  ;;  %p513_p7 = scmp.lt.s32.totalorder %s511_s8, %s504_s25 }
  0x44   : > { %p508_p11 = pneg %p507_p9  ;;  %p514_p3 = por %p513_p7, %p512_p8 }
  0x46   : > { %p515_p6 = pnand %p514_p3, %p508_p11 }
  0x48   : > { %518 = shalt.err (!%p515_p6)
}
  0x49   : > { %399 = dma.hbm_to_vmem [thread:$0]  (!%p708_p0), %s753_s16, 128, %s180_s19, %s167_s30  }
  0x4a   : > { %p860_p13 = scmp.ne.s32.totalorder %s859_s7, 0 }
  0x4b   : > { %s780_s15 = sand.u32 (!%p860_p13), 1, %s589_s10   ;;  %p861_p5 = scmp.ne.s32.totalorder (!%p860_p13), %s853_s21, 0 }
  0x4c   : > { %188 = sbr.rel (%p860_p13) target bundleno = 134 (0x86), region = 28  ;;  %s382_s18 = sshll.u32 (!%p860_p13), %s780_s15, 3 }
  0x4d   : > { %s191_s4 = scalar_lea.sflag (!%p860_p13), [#allocation3], %s780_s15  ;;  %s194_s6 = scalar_lea.vmem (!%p860_p13), [#allocation2], %s382_s18 }
  0x53   : > { %572 = dma.done.wait (%p861_p5), %s191_s4, 128  }
  0x54   : > { %574 = vsyncadd (%p861_p5), %s191_s4, 4294967168  ;;  %s200_s5 = scalar_lea.sflag [#allocation6], %s780_s15  ;;  %s203_s16 = scalar_lea.vmem [#allocation5], %s382_s18 }
  0x55   : > { %576 = dma.done.wait (%p861_p5), %s200_s5, 128  }
  0x56   : > { %578 = vsyncadd (%p861_p5), %s200_s5, 4294967168  ;;  %s227_s7 = scalar_lea.vmem [#allocation7], %s780_s15  ;;  %v609_v0 = vmov 0.0   ;;  %v235_v1 = vld [vmem:[%s194_s6] sm:$0xff]  ;;  %v236_v2 = vld [vmem:[%s203_s16] sm:$0xff]  ;;  %s384_s21 = sshll.u32 %s597_s12, 4 }
  0x57   : > { %234 = vst [vmem:[%s227_s7] sm:$0x1] %v609_v0  ;;  %vm237_vm0 = vcmp.eq.f32.partialorder %v236_v2, 0.0  ;;  %455 = vlog2.f32 %v235_v1  ;;  %s268_s19 = sshll.u32 %s227_s7, 4  ;;  %s798_s27 = scalar_lea.hbm %s849_s2, %s384_s21  ;;  %s800_s19 = int_to_ptr.vmem [resolvable:$true] %s268_s19 }
  0x58   : > { %v238_v3 = vsel %vm237_vm0, 1e-24, %v236_v2  ;;  %s255_s28 = scalar_lea.sflag [#allocation4], %s780_s15  ;;  %s519_s29 = scalar_lea.vmem %s800_s19, 16 }
  0x59   : > { %457 = vlog2.f32 %v238_v3  ;;  %p520_p8 = scmp.ne.s32.totalorder %s800_s19, %s519_s29  ;;  %p862_p0 = scmp.ne.s32.totalorder %s854_s22, 0 }
  0x5a   : > { %s610_s12 = smov [#allocation7]  }
  0x5b   : > { %p521_p7 = pnand %p520_p8, %p862_p0  ;;  %s523_s25 = sshll.u32 %s610_s12, 4  ;;  %s524_s25 = int_to_ptr.vmem [resolvable:$false] %s523_s25 }
  0x5c   : > { %s525_s26 = scalar_lea.vmem %s524_s25, 32  ;;  %p526_p10 = scmp.lt.s32.totalorder %s800_s19, %s524_s25 }
  0x5d   : > { %p522_p4 = pneg %p521_p7  ;;  %p527_p12 = scmp.lt.s32.totalorder %s525_s26, %s519_s29 }
  0x5e   : > { %v245_v15 = vld [vmem:[%s227_s7] sm:$0x1] }
  0x5f   : > { %p528_p1 = por %p527_p12, %p526_p10 }
  0x61   : > { %v456_v4 = vpop.eup %455  ;;  %p529_p2 = pnand %p528_p1, %p522_p4 }
  0x62   : > { %v240_v5 = vmul.f32 0.6931472, %v456_v4 }
  0x63   : > { %v458_v6 = vpop.eup %457 }
  0x64   : > { %v242_v7 = vmul.f32 0.6931472, %v458_v6 }
  0x66   : > { %v243_v8 = vsub.f32 %v240_v5, %v242_v7 }
  0x68   : > { %v244_v9 = vmul.f32 %v243_v8, %v243_v8 }
  0x6a   : > { %v246_v10 = vrot.slane %v244_v9, 4 }
  0x6c   : > { %v247_v11 = vadd.f32 %v246_v10, %v244_v9 }
  0x6e   : > { %v248_v12 = vrot.slane %v247_v11, 2 }
  0x70   : > { %v249_v13 = vadd.f32 %v248_v12, %v247_v11 }
  0x72   : > { %v250_v14 = vrot.slane %v249_v13, 1 }
  0x74   : > { %v251_v16 = vadd.f32 %v250_v14, %v249_v13 }
  0x76   : > { %v252_v17 = vadd.f32 %v251_v16, %v245_v15 }
  0x78   : > { %253 = vst [vmem:[%s227_s7] sm:$0x1] %v252_v17 }
  0x79   : > { %532 = shalt.err (!%p529_p2)
}
  0x7a   : > { %s533_s3 = scalar_lea.hbm %s798_s27, 16  ;;  %s537_s18 = scalar_lea.hbm %s849_s2, 32 }
  0x7b   : > { %p534_p9 = scmp.ne.s32.totalorder %s798_s27, %s533_s3  ;;  %p538_p6 = scmp.lt.u32.totalorder %s798_s27, %s849_s2 }
  0x7c   : > { %p539_p13 = scmp.lt.u32.totalorder %s537_s18, %s533_s3  ;;  %p541_p8 = scmp.lt.u32.totalorder %s533_s3, %s798_s27 }
  0x7d   : > { %p535_p11 = pnand %p534_p9, %p862_p0 }
  0x7e   : > { %p540_p5 = por %p539_p13, %p538_p6 }
  0x7f   : > { %p536_p3 = pneg %p535_p11 }
  0x80   : > { %p542_p7 = por %p541_p8, %p540_p5 }
  0x82   : > { %p543_p4 = pnand %p542_p7, %p536_p3 }
  0x84   : > { %546 = shalt.err (!%p543_p4)
}
  0x85   : > { %391 = dma.vmem_to_hbm [thread:$0]  (%p862_p0), %s800_s19, 16, %s798_s27, %s255_s28  }
  0x86 PF: > { %s280_s5 = sand.u32 1, %s585_s9   ;;  %p863_p10 = scmp.ne.s32.totalorder %s855_s24, 0 }
  0x87   : > { %p864_p12 = scmp.ge.s32.totalorder %s605_s14, 2  ;;  %s281_s16 = scalar_lea.sflag [#allocation4], %s280_s5 }
  0x89   : > { %p401_p1 = pnand %p864_p12, %p863_p10 }
  0x8b   : > { %580 = dma.done.wait (!%p401_p1), %s281_s16, 16  }
  0x8c   : > { %582 = vsyncadd (!%p401_p1), %s281_s16, 4294967280  ;;  %s21_s14 = sadd.s32 1, %s605_s14   ;;  %s865_s9 = smov %s589_s10 }
  0x8d   : > { %p18_p2 = scmp.ge.s32.totalorder %s21_s14, 4   ;;  %s866_s10 = smov %s593_s11 }
  0x8e   : > { %s867_s11 = smov %s682_s23  ;;  %s868_s12 = smov %s601_s13 }
  0x8f   : > { %s869_s13 = smov %s871_s17  ;;  %20 = sbr.rel (!%p18_p2) target bundleno = 8 (0x8), region = 90 }
  0x96   :  { %285 = vsyncpa [#allocation3], 1 }
  0x97   :  { %287 = vsyncpa [#allocation3 + $0x1], 1 }
  0x98   :  { %288 = vsyncpa [#allocation6], 1 }
  0x99   :  { %290 = vsyncpa [#allocation6 + $0x1], 1 }
  0x9a   :  { %291 = vsyncpa [#allocation4], 1 }
  0x9b   :  { %293 = vsyncpa [#allocation4 + $0x1], 1 }

</bundles_post_ra>
